<compile_context>
chip_gen: v5e
topology: v5e:2x2
jax: 0.10.0
libtpu: 0.0.40
codegen_flags: <defaults>
</compile_context>

<pallas_src>
import functools

import jax
import jax.numpy as jnp
from jax.experimental import pallas as pl
from jax.experimental.pallas import tpu as pltpu

# ---- model hyper-parameters (module globals in the PyTorch code) ----
D_MODEL = 32
D_K = 16
D_V = 16
N_HEAD = 4
SEQ = 8
BATCH = 2
LN_EPS = 1e-5

_HK = N_HEAD * D_K            # 64
_HV = N_HEAD * D_V            # 64
_WCOLS = 2 * _HK + _HV        # 192
_WROWS = D_MODEL + _HV        # 96


def _mha_kernel(q_ref, k_ref, v_ref, mask_ref, w_ref, vec_ref, out_ref, attn_ref):
    BB, S, _ = q_ref.shape          # batch-block, sequence length
    N = BB * S

    # ---- flatten inputs to (BB*S, d_model); leading-dim merge is layout-free ----
    q_in = q_ref[...].reshape(N, D_MODEL)
    k_in = k_ref[...].reshape(N, D_MODEL)
    v_in = v_ref[...].reshape(N, D_MODEL)

    w = w_ref[...]                  # (96, 192) packed weight slab
    vec = vec_ref[...]              # (8, 192)  packed bias / LN slab
    w_qkv = w[:D_MODEL, :]          # (32, 192) = [wq*s | wk | wv]
    b_qkv = vec[0:1, :]             # (1, 192)  = [bq*s | bk | bv]
    b_o = vec[1:2, :D_MODEL]        # (1, 32)
    gamma = vec[2:3, :D_MODEL]      # (1, 32)
    beta = vec[3:4, :D_MODEL]       # (1, 32)

    # ---- fused Q/K/V projection: one MXU matmul, single RHS push ----
    # Row-stack the three inputs (sublane-aligned blocks of 16 rows each).
    stacked = jnp.concatenate([q_in, k_in, v_in], axis=0)                 # (3N, 32)
    proj = jnp.dot(stacked, w_qkv, preferred_element_type=jnp.float32) + b_qkv  # (3N, 192)
    # q rows use cols 0:64, k rows cols 64:128, v rows cols 128:192; the bias
    # added to the unused (row-block, col-block) pairs is never read.

    # ---- additive mask bias, computed once, broadcast over heads (no replication) ----
    neg_bias = jnp.where(mask_ref[...] != 0, jnp.float32(-1e9), jnp.float32(0.0))  # (BB,S,S)

    # ---- per-head attention: mask-add + softmax + attn store + PV + out-proj acc ----
    out_acc = jnp.zeros((N, D_MODEL), jnp.float32)
    for h in range(N_HEAD):          # static loop; all slices sublane/lane static
        qh = proj[0:N, h * D_K:(h + 1) * D_K].reshape(BB, S, D_K)
        kh = proj[N:2 * N, _HK + h * D_K:_HK + (h + 1) * D_K].reshape(BB, S, D_K)
        vh = proj[2 * N:3 * N, 2 * _HK + h * D_V:2 * _HK + (h + 1) * D_V].reshape(BB, S, D_V)

        s_h = jnp.einsum('bqd,bkd->bqk', qh, kh,
                         preferred_element_type=jnp.float32) + neg_bias   # (BB,S,S)
        s_h = s_h - jnp.max(s_h, axis=-1, keepdims=True)
        e = jnp.exp(s_h)
        attn_h = e * pl.reciprocal(jnp.sum(e, axis=-1, keepdims=True), approx=False)

        # Direct 4-D store of the attention map for this head (no repack).
        attn_ref[:, h, :, :] = attn_h.astype(attn_ref.dtype)

        ctx_h = jnp.einsum('bqk,bkd->bqd', attn_h, vh,
                           preferred_element_type=jnp.float32).reshape(N, D_V)
        w_o_h = w[D_MODEL + h * D_V:D_MODEL + (h + 1) * D_V, :D_MODEL]    # (16, 32)
        out_acc = out_acc + jnp.dot(ctx_h, w_o_h, preferred_element_type=jnp.float32)

    # ---- output bias + residual + LayerNorm ----
    y = out_acc + b_o + q_in
    mean = jnp.mean(y, axis=-1, keepdims=True)
    var = jnp.mean((y - mean) ** 2, axis=-1, keepdims=True)
    normed = (y - mean) * jax.lax.rsqrt(var + jnp.float32(LN_EPS))
    y_out = normed * gamma + beta

    out_ref[...] = y_out.reshape(BB, S, D_MODEL).astype(out_ref.dtype)


def pack_params(params):
    """One-time packing of the 10 parameter arrays into two f32 slabs."""
    wq, bq, wk, bk, wv, bv, wo, bo, gamma, beta = params
    scale = jnp.float32(1.0 / (D_K ** 0.5))   # 0.25: exact power of two

    w_slab = jnp.zeros((_WROWS, _WCOLS), jnp.float32)
    w_slab = w_slab.at[:D_MODEL, :_HK].set(wq * scale)
    w_slab = w_slab.at[:D_MODEL, _HK:2 * _HK].set(wk)
    w_slab = w_slab.at[:D_MODEL, 2 * _HK:].set(wv)
    w_slab = w_slab.at[D_MODEL:D_MODEL + _HV, :D_MODEL].set(wo)

    vec_slab = jnp.zeros((8, _WCOLS), jnp.float32)
    vec_slab = vec_slab.at[0, :_HK].set((bq * scale).reshape(-1))
    vec_slab = vec_slab.at[0, _HK:2 * _HK].set(bk.reshape(-1))
    vec_slab = vec_slab.at[0, 2 * _HK:].set(bv.reshape(-1))
    vec_slab = vec_slab.at[1, :D_MODEL].set(bo.reshape(-1))
    vec_slab = vec_slab.at[2, :D_MODEL].set(gamma.reshape(-1))
    vec_slab = vec_slab.at[3, :D_MODEL].set(beta.reshape(-1))
    return w_slab, vec_slab


@functools.partial(jax.jit, static_argnames=("batch_block",))
def multi_head_attention(Q, K, V, attn_mask, w_slab, vec_slab, *, batch_block=None):
    """Q, K, V: (B, S, d_model) f32. attn_mask: (B, S, S) int32 (nonzero=masked).

    w_slab / vec_slab come from pack_params().  Default batch_block=B keeps the
    whole (tiny) batch in one grid step — do not split it across cores at this size.
    """
    B, S, _ = Q.shape
    bb = B if batch_block is None else batch_block
    assert B % bb == 0, "batch_block must divide the batch size"

    out, attn = pl.pallas_call(
        _mha_kernel,
        out_shape=(
            jax.ShapeDtypeStruct((B, S, D_MODEL), jnp.float32),
            jax.ShapeDtypeStruct((B, N_HEAD, S, S), jnp.float32),
        ),
        grid_spec=pltpu.PrefetchScalarGridSpec(
            num_scalar_prefetch=0,
            grid=(B // bb,),
            in_specs=[
                pl.BlockSpec((bb, S, D_MODEL), lambda b: (b, 0, 0)),   # Q
                pl.BlockSpec((bb, S, D_MODEL), lambda b: (b, 0, 0)),   # K
                pl.BlockSpec((bb, S, D_MODEL), lambda b: (b, 0, 0)),   # V
                pl.BlockSpec((bb, S, S), lambda b: (b, 0, 0)),         # mask
                pl.BlockSpec((_WROWS, _WCOLS), lambda b: (0, 0)),      # packed weights
                pl.BlockSpec((8, _WCOLS), lambda b: (0, 0)),           # packed biases/LN
            ],
            out_specs=[
                pl.BlockSpec((bb, S, D_MODEL), lambda b: (b, 0, 0)),
                pl.BlockSpec((bb, N_HEAD, S, S), lambda b: (b, 0, 0, 0)),
            ],
        ),
        compiler_params=pltpu.CompilerParams(dimension_semantics=("arbitrary",)),
    )(Q, K, V, attn_mask, w_slab, vec_slab)
    return out, attn


def _reference(Q, K, V, attn_mask, params):
    """Plain-JAX reference matching the PyTorch forward."""
    wq, bq, wk, bk, wv, bv, wo, bo, gamma, beta = params
    B, S, _ = Q.shape
    q_s = (Q @ wq + bq).reshape(B, S, N_HEAD, D_K).transpose(0, 2, 1, 3)
    k_s = (K @ wk + bk).reshape(B, S, N_HEAD, D_K).transpose(0, 2, 1, 3)
    v_s = (V @ wv + bv).reshape(B, S, N_HEAD, D_V).transpose(0, 2, 1, 3)
    mask = (attn_mask != 0)[:, None, :, :]
    scores = jnp.einsum('bhqd,bhkd->bhqk', q_s, k_s) / jnp.sqrt(jnp.float32(D_K))
    scores = jnp.where(mask, -1e9, scores)
    attn = jax.nn.softmax(scores, axis=-1)
    context = jnp.einsum('bhqk,bhkd->bhqd', attn, v_s)
    context = context.transpose(0, 2, 1, 3).reshape(B, S, N_HEAD * D_V)
    out = context @ wo + bo
    y = out + Q
    mean = jnp.mean(y, axis=-1, keepdims=True)
    var = jnp.mean((y - mean) ** 2, axis=-1, keepdims=True)
    return (y - mean) * jax.lax.rsqrt(var + LN_EPS) * gamma + beta, attn


def _init_params(key):
    ks = jax.random.split(key, 8)
    s = 0.1
    wq = jax.random.normal(ks[0], (D_MODEL, N_HEAD * D_K), jnp.float32) * s
    bq = jax.random.normal(ks[1], (1, N_HEAD * D_K), jnp.float32) * s
    wk = jax.random.normal(ks[2], (D_MODEL, N_HEAD * D_K), jnp.float32) * s
    bk = jax.random.normal(ks[3], (1, N_HEAD * D_K), jnp.float32) * s
    wv = jax.random.normal(ks[4], (D_MODEL, N_HEAD * D_V), jnp.float32) * s
    bv = jax.random.normal(ks[5], (1, N_HEAD * D_V), jnp.float32) * s
    wo = jax.random.normal(ks[6], (N_HEAD * D_V, D_MODEL), jnp.float32) * s
    bo = jax.random.normal(ks[7], (1, D_MODEL), jnp.float32) * s
    gamma = jnp.ones((1, D_MODEL), jnp.float32)
    beta = jnp.zeros((1, D_MODEL), jnp.float32)
    return (wq, bq, wk, bk, wv, bv, wo, bo, gamma, beta)


if __name__ == "__main__":
    key = jax.random.PRNGKey(0)
    kq, kk, kv, kp = jax.random.split(key, 4)
    Q = jax.random.normal(kq, (BATCH, SEQ, D_MODEL), jnp.float32)
    K = jax.random.normal(kk, (BATCH, SEQ, D_MODEL), jnp.float32)
    V = jax.random.normal(kv, (BATCH, SEQ, D_MODEL), jnp.float32)
    # mask future positions (no row is fully masked -> softmax well defined)
    causal = (jnp.arange(SEQ)[None, :] > jnp.arange(SEQ)[:, None]).astype(jnp.int32)
    attn_mask = jnp.broadcast_to(causal, (BATCH, SEQ, SEQ))

    params = _init_params(kp)
    w_slab, vec_slab = pack_params(params)      # one-time packing, outside the hot call

    out, attn = multi_head_attention(Q, K, V, attn_mask, w_slab, vec_slab)
    jax.block_until_ready((out, attn))

    ref_out, ref_attn = _reference(Q, K, V, attn_mask, params)
    assert jnp.allclose(out, ref_out, atol=1e-4, rtol=1e-4), "output mismatch"
    assert jnp.allclose(attn, ref_attn, atol=1e-4, rtol=1e-4), "attention map mismatch"

    print("KERNEL_OK")
</pallas_src>

<mosaic_0001>
module attributes {stable_mosaic.version = 11 : i64} {
  func.func @_mha_kernel(%arg0: i32, %arg1: memref<2x8x32xf32, #tpu.memory_space<vmem>>, %arg2: memref<2x8x32xf32, #tpu.memory_space<vmem>>, %arg3: memref<2x8x32xf32, #tpu.memory_space<vmem>>, %arg4: memref<2x8x8xi32, #tpu.memory_space<vmem>>, %arg5: memref<96x192xf32, #tpu.memory_space<vmem>>, %arg6: memref<8x192xf32, #tpu.memory_space<vmem>>, %arg7: memref<2x8x32xf32, #tpu.memory_space<vmem>>, %arg8: memref<2x4x8x8xf32, #tpu.memory_space<vmem>>) attributes {dimension_semantics = [#tpu.dimension_semantics<arbitrary>], iteration_bounds = array<i64: 1>, scalar_prefetch = 0 : i64, scratch_operands = 0 : i64, tpu.core_type = #tpu.core_type<tc>, window_params = [{transform_indices = @transform_0, window_bounds = array<i64: 2, 8, 32>}, {transform_indices = @transform_1, window_bounds = array<i64: 2, 8, 32>}, {transform_indices = @transform_2, window_bounds = array<i64: 2, 8, 32>}, {transform_indices = @transform_3, window_bounds = array<i64: 2, 8, 8>}, {pipeline_mode = #tpu.pipeline_mode<synchronous>, transform_indices = @transform_4, window_bounds = array<i64: 96, 192>}, {pipeline_mode = #tpu.pipeline_mode<synchronous>, transform_indices = @transform_5, window_bounds = array<i64: 8, 192>}, {transform_indices = @transform_6, window_bounds = array<i64: 2, 8, 32>}, {transform_indices = @transform_7, window_bounds = array<i64: 2, 4, 8, 8>}]} {
    %c0 = arith.constant 0 : index
    %c0_0 = arith.constant 0 : index
    %c0_1 = arith.constant 0 : index
    %0 = vector.load %arg1[%c0, %c0_0, %c0_1] : memref<2x8x32xf32, #tpu.memory_space<vmem>>, vector<2x8x32xf32>
    %1 = vector.shape_cast %0 : vector<2x8x32xf32> to vector<16x32xf32>
    %c0_2 = arith.constant 0 : index
    %c0_3 = arith.constant 0 : index
    %c0_4 = arith.constant 0 : index
    %2 = vector.load %arg2[%c0_2, %c0_3, %c0_4] : memref<2x8x32xf32, #tpu.memory_space<vmem>>, vector<2x8x32xf32>
    %3 = vector.shape_cast %2 : vector<2x8x32xf32> to vector<16x32xf32>
    %c0_5 = arith.constant 0 : index
    %c0_6 = arith.constant 0 : index
    %c0_7 = arith.constant 0 : index
    %4 = vector.load %arg3[%c0_5, %c0_6, %c0_7] : memref<2x8x32xf32, #tpu.memory_space<vmem>>, vector<2x8x32xf32>
    %5 = vector.shape_cast %4 : vector<2x8x32xf32> to vector<16x32xf32>
    %c0_8 = arith.constant 0 : index
    %c0_9 = arith.constant 0 : index
    %6 = vector.load %arg5[%c0_8, %c0_9] : memref<96x192xf32, #tpu.memory_space<vmem>>, vector<96x192xf32>
    %c0_10 = arith.constant 0 : index
    %c0_11 = arith.constant 0 : index
    %7 = vector.load %arg6[%c0_10, %c0_11] : memref<8x192xf32, #tpu.memory_space<vmem>>, vector<8x192xf32>
    %8 = vector.extract_strided_slice %6 {offsets = [0, 0], sizes = [32, 192], strides = [1, 1]} : vector<96x192xf32> to vector<32x192xf32>
    %9 = vector.extract_strided_slice %7 {offsets = [0, 0], sizes = [1, 192], strides = [1, 1]} : vector<8x192xf32> to vector<1x192xf32>
    %10 = vector.extract_strided_slice %7 {offsets = [1, 0], sizes = [1, 32], strides = [1, 1]} : vector<8x192xf32> to vector<1x32xf32>
    %11 = vector.extract_strided_slice %7 {offsets = [2, 0], sizes = [1, 32], strides = [1, 1]} : vector<8x192xf32> to vector<1x32xf32>
    %12 = vector.extract_strided_slice %7 {offsets = [3, 0], sizes = [1, 32], strides = [1, 1]} : vector<8x192xf32> to vector<1x32xf32>
    %13 = tpu.concatenate %1, %3, %5 in 0 : vector<16x32xf32>, vector<16x32xf32>, vector<16x32xf32> -> vector<48x32xf32>
    %cst = arith.constant dense<0.000000e+00> : vector<48x192xf32>
    %14 = tpu.matmul %13, %8, %cst {dimension_numbers = #tpu.dot_dimension_numbers<[1], [0], [0], [1], [0, 0, 1, 1], [], []>} : vector<48x32xf32>, vector<32x192xf32>, vector<48x192xf32> -> vector<48x192xf32>
    %15 = vector.broadcast %9 : vector<1x192xf32> to vector<48x192xf32>
    %16 = arith.addf %14, %15 : vector<48x192xf32>
    %c0_12 = arith.constant 0 : index
    %c0_13 = arith.constant 0 : index
    %c0_14 = arith.constant 0 : index
    %17 = vector.load %arg4[%c0_12, %c0_13, %c0_14] : memref<2x8x8xi32, #tpu.memory_space<vmem>>, vector<2x8x8xi32>
    %c0_i32 = arith.constant 0 : i32
    %18 = vector.broadcast %c0_i32 : i32 to vector<2x8x8xi32>
    %19 = arith.cmpi ne, %17, %18 : vector<2x8x8xi32>
    %cst_15 = arith.constant -1.000000e+09 : f32
    %cst_16 = arith.constant 0.000000e+00 : f32
    %20 = vector.broadcast %cst_15 : f32 to vector<2x8x8xf32>
    %21 = vector.broadcast %cst_16 : f32 to vector<2x8x8xf32>
    %22 = arith.select %19, %20, %21 : vector<2x8x8xi1>, vector<2x8x8xf32>
    %cst_17 = arith.constant 0.000000e+00 : f32
    %23 = vector.broadcast %cst_17 : f32 to vector<16x32xf32>
    %24 = vector.extract_strided_slice %16 {offsets = [0, 0], sizes = [16, 16], strides = [1, 1]} : vector<48x192xf32> to vector<16x16xf32>
    %25 = vector.shape_cast %24 : vector<16x16xf32> to vector<2x8x16xf32>
    %26 = vector.extract_strided_slice %16 {offsets = [16, 64], sizes = [16, 16], strides = [1, 1]} : vector<48x192xf32> to vector<16x16xf32>
    %27 = vector.shape_cast %26 : vector<16x16xf32> to vector<2x8x16xf32>
    %28 = vector.extract_strided_slice %16 {offsets = [32, 128], sizes = [16, 16], strides = [1, 1]} : vector<48x192xf32> to vector<16x16xf32>
    %29 = vector.shape_cast %28 : vector<16x16xf32> to vector<2x8x16xf32>
    "tpu.trace_start"() <{level = 10 : i32, message = "bqd,bkd->bqk"}> : () -> ()
    %cst_18 = arith.constant dense<0.000000e+00> : vector<2x8x8xf32>
    %30 = tpu.matmul %25, %27, %cst_18 {dimension_numbers = #tpu.dot_dimension_numbers<[2], [2], [1], [1], [0, 0, 0, 1, 1, 1], [0], [0]>} : vector<2x8x16xf32>, vector<2x8x16xf32>, vector<2x8x8xf32> -> vector<2x8x8xf32>
    "tpu.trace_stop"() : () -> ()
    %31 = arith.addf %30, %22 : vector<2x8x8xf32>
    %cst_19 = arith.constant dense<0xFF800000> : vector<2x8xf32>
    %32 = vector.multi_reduction <maximumf>, %31, %cst_19 [2] : vector<2x8x8xf32> to vector<2x8xf32>
    %33 = vector.shape_cast %32 : vector<2x8xf32> to vector<2x8x1xf32>
    %34 = vector.broadcast %33 : vector<2x8x1xf32> to vector<2x8x8xf32>
    %35 = arith.subf %31, %34 : vector<2x8x8xf32>
    %36 = math.exp %35 : vector<2x8x8xf32>
    %cst_20 = arith.constant dense<0.000000e+00> : vector<2x8xf32>
    %37 = vector.multi_reduction <add>, %36, %cst_20 [2] : vector<2x8x8xf32> to vector<2x8xf32>
    %38 = vector.shape_cast %37 : vector<2x8xf32> to vector<2x8x1xf32>
    %39 = tpu.reciprocal %38 : vector<2x8x1xf32> -> vector<2x8x1xf32>
    %40 = vector.broadcast %39 : vector<2x8x1xf32> to vector<2x8x8xf32>
    %41 = arith.mulf %36, %40 : vector<2x8x8xf32>
    %c0_21 = arith.constant 0 : index
    %c0_22 = arith.constant 0 : index
    %c0_23 = arith.constant 0 : index
    %c0_24 = arith.constant 0 : index
    %42 = vector.load %arg8[%c0_21, %c0_22, %c0_23, %c0_24] : memref<2x4x8x8xf32, #tpu.memory_space<vmem>>, vector<2x1x8x8xf32>
    %43 = vector.shape_cast %42 : vector<2x1x8x8xf32> to vector<2x8x8xf32>
    %44 = vector.shape_cast %41 : vector<2x8x8xf32> to vector<2x1x8x8xf32>
    tpu.vector_store %arg8[%c0_21, %c0_22, %c0_23, %c0_24], %44 {strides = array<i32>} : memref<2x4x8x8xf32, #tpu.memory_space<vmem>>, vector<2x1x8x8xf32>,
    "tpu.trace_start"() <{level = 10 : i32, message = "bqk,bkd->bqd"}> : () -> ()
    %cst_25 = arith.constant dense<0.000000e+00> : vector<2x8x16xf32>
    %45 = tpu.matmul %41, %29, %cst_25 {dimension_numbers = #tpu.dot_dimension_numbers<[2], [1], [1], [2], [0, 0, 0, 1, 1, 2], [0], [0]>} : vector<2x8x8xf32>, vector<2x8x16xf32>, vector<2x8x16xf32> -> vector<2x8x16xf32>
    "tpu.trace_stop"() : () -> ()
    %46 = vector.shape_cast %45 : vector<2x8x16xf32> to vector<16x16xf32>
    %47 = vector.extract_strided_slice %6 {offsets = [32, 0], sizes = [16, 32], strides = [1, 1]} : vector<96x192xf32> to vector<16x32xf32>
    %cst_26 = arith.constant dense<0.000000e+00> : vector<16x32xf32>
    %48 = tpu.matmul %46, %47, %cst_26 {dimension_numbers = #tpu.dot_dimension_numbers<[1], [0], [0], [1], [0, 0, 1, 1], [], []>} : vector<16x16xf32>, vector<16x32xf32>, vector<16x32xf32> -> vector<16x32xf32>
    %49 = arith.addf %23, %48 : vector<16x32xf32>
    %50 = vector.extract_strided_slice %16 {offsets = [0, 16], sizes = [16, 16], strides = [1, 1]} : vector<48x192xf32> to vector<16x16xf32>
    %51 = vector.shape_cast %50 : vector<16x16xf32> to vector<2x8x16xf32>
    %52 = vector.extract_strided_slice %16 {offsets = [16, 80], sizes = [16, 16], strides = [1, 1]} : vector<48x192xf32> to vector<16x16xf32>
    %53 = vector.shape_cast %52 : vector<16x16xf32> to vector<2x8x16xf32>
    %54 = vector.extract_strided_slice %16 {offsets = [32, 144], sizes = [16, 16], strides = [1, 1]} : vector<48x192xf32> to vector<16x16xf32>
    %55 = vector.shape_cast %54 : vector<16x16xf32> to vector<2x8x16xf32>
    "tpu.trace_start"() <{level = 10 : i32, message = "bqd,bkd->bqk"}> : () -> ()
    %cst_27 = arith.constant dense<0.000000e+00> : vector<2x8x8xf32>
    %56 = tpu.matmul %51, %53, %cst_27 {dimension_numbers = #tpu.dot_dimension_numbers<[2], [2], [1], [1], [0, 0, 0, 1, 1, 1], [0], [0]>} : vector<2x8x16xf32>, vector<2x8x16xf32>, vector<2x8x8xf32> -> vector<2x8x8xf32>
    "tpu.trace_stop"() : () -> ()
    %57 = arith.addf %56, %22 : vector<2x8x8xf32>
    %cst_28 = arith.constant dense<0xFF800000> : vector<2x8xf32>
    %58 = vector.multi_reduction <maximumf>, %57, %cst_28 [2] : vector<2x8x8xf32> to vector<2x8xf32>
    %59 = vector.shape_cast %58 : vector<2x8xf32> to vector<2x8x1xf32>
    %60 = vector.broadcast %59 : vector<2x8x1xf32> to vector<2x8x8xf32>
    %61 = arith.subf %57, %60 : vector<2x8x8xf32>
    %62 = math.exp %61 : vector<2x8x8xf32>
    %cst_29 = arith.constant dense<0.000000e+00> : vector<2x8xf32>
    %63 = vector.multi_reduction <add>, %62, %cst_29 [2] : vector<2x8x8xf32> to vector<2x8xf32>
    %64 = vector.shape_cast %63 : vector<2x8xf32> to vector<2x8x1xf32>
    %65 = tpu.reciprocal %64 : vector<2x8x1xf32> -> vector<2x8x1xf32>
    %66 = vector.broadcast %65 : vector<2x8x1xf32> to vector<2x8x8xf32>
    %67 = arith.mulf %62, %66 : vector<2x8x8xf32>
    %c0_30 = arith.constant 0 : index
    %c1 = arith.constant 1 : index
    %c0_31 = arith.constant 0 : index
    %c0_32 = arith.constant 0 : index
    %68 = vector.load %arg8[%c0_30, %c1, %c0_31, %c0_32] : memref<2x4x8x8xf32, #tpu.memory_space<vmem>>, vector<2x1x8x8xf32>
    %69 = vector.shape_cast %68 : vector<2x1x8x8xf32> to vector<2x8x8xf32>
    %70 = vector.shape_cast %67 : vector<2x8x8xf32> to vector<2x1x8x8xf32>
    tpu.vector_store %arg8[%c0_30, %c1, %c0_31, %c0_32], %70 {strides = array<i32>} : memref<2x4x8x8xf32, #tpu.memory_space<vmem>>, vector<2x1x8x8xf32>,
    "tpu.trace_start"() <{level = 10 : i32, message = "bqk,bkd->bqd"}> : () -> ()
    %cst_33 = arith.constant dense<0.000000e+00> : vector<2x8x16xf32>
    %71 = tpu.matmul %67, %55, %cst_33 {dimension_numbers = #tpu.dot_dimension_numbers<[2], [1], [1], [2], [0, 0, 0, 1, 1, 2], [0], [0]>} : vector<2x8x8xf32>, vector<2x8x16xf32>, vector<2x8x16xf32> -> vector<2x8x16xf32>
    "tpu.trace_stop"() : () -> ()
    %72 = vector.shape_cast %71 : vector<2x8x16xf32> to vector<16x16xf32>
    %73 = vector.extract_strided_slice %6 {offsets = [48, 0], sizes = [16, 32], strides = [1, 1]} : vector<96x192xf32> to vector<16x32xf32>
    %cst_34 = arith.constant dense<0.000000e+00> : vector<16x32xf32>
    %74 = tpu.matmul %72, %73, %cst_34 {dimension_numbers = #tpu.dot_dimension_numbers<[1], [0], [0], [1], [0, 0, 1, 1], [], []>} : vector<16x16xf32>, vector<16x32xf32>, vector<16x32xf32> -> vector<16x32xf32>
    %75 = arith.addf %49, %74 : vector<16x32xf32>
    %76 = vector.extract_strided_slice %16 {offsets = [0, 32], sizes = [16, 16], strides = [1, 1]} : vector<48x192xf32> to vector<16x16xf32>
    %77 = vector.shape_cast %76 : vector<16x16xf32> to vector<2x8x16xf32>
    %78 = vector.extract_strided_slice %16 {offsets = [16, 96], sizes = [16, 16], strides = [1, 1]} : vector<48x192xf32> to vector<16x16xf32>
    %79 = vector.shape_cast %78 : vector<16x16xf32> to vector<2x8x16xf32>
    %80 = vector.extract_strided_slice %16 {offsets = [32, 160], sizes = [16, 16], strides = [1, 1]} : vector<48x192xf32> to vector<16x16xf32>
    %81 = vector.shape_cast %80 : vector<16x16xf32> to vector<2x8x16xf32>
    "tpu.trace_start"() <{level = 10 : i32, message = "bqd,bkd->bqk"}> : () -> ()
    %cst_35 = arith.constant dense<0.000000e+00> : vector<2x8x8xf32>
    %82 = tpu.matmul %77, %79, %cst_35 {dimension_numbers = #tpu.dot_dimension_numbers<[2], [2], [1], [1], [0, 0, 0, 1, 1, 1], [0], [0]>} : vector<2x8x16xf32>, vector<2x8x16xf32>, vector<2x8x8xf32> -> vector<2x8x8xf32>
    "tpu.trace_stop"() : () -> ()
    %83 = arith.addf %82, %22 : vector<2x8x8xf32>
    %cst_36 = arith.constant dense<0xFF800000> : vector<2x8xf32>
    %84 = vector.multi_reduction <maximumf>, %83, %cst_36 [2] : vector<2x8x8xf32> to vector<2x8xf32>
    %85 = vector.shape_cast %84 : vector<2x8xf32> to vector<2x8x1xf32>
    %86 = vector.broadcast %85 : vector<2x8x1xf32> to vector<2x8x8xf32>
    %87 = arith.subf %83, %86 : vector<2x8x8xf32>
    %88 = math.exp %87 : vector<2x8x8xf32>
    %cst_37 = arith.constant dense<0.000000e+00> : vector<2x8xf32>
    %89 = vector.multi_reduction <add>, %88, %cst_37 [2] : vector<2x8x8xf32> to vector<2x8xf32>
    %90 = vector.shape_cast %89 : vector<2x8xf32> to vector<2x8x1xf32>
    %91 = tpu.reciprocal %90 : vector<2x8x1xf32> -> vector<2x8x1xf32>
    %92 = vector.broadcast %91 : vector<2x8x1xf32> to vector<2x8x8xf32>
    %93 = arith.mulf %88, %92 : vector<2x8x8xf32>
    %c0_38 = arith.constant 0 : index
    %c2 = arith.constant 2 : index
    %c0_39 = arith.constant 0 : index
    %c0_40 = arith.constant 0 : index
    %94 = vector.load %arg8[%c0_38, %c2, %c0_39, %c0_40] : memref<2x4x8x8xf32, #tpu.memory_space<vmem>>, vector<2x1x8x8xf32>
    %95 = vector.shape_cast %94 : vector<2x1x8x8xf32> to vector<2x8x8xf32>
    %96 = vector.shape_cast %93 : vector<2x8x8xf32> to vector<2x1x8x8xf32>
    tpu.vector_store %arg8[%c0_38, %c2, %c0_39, %c0_40], %96 {strides = array<i32>} : memref<2x4x8x8xf32, #tpu.memory_space<vmem>>, vector<2x1x8x8xf32>,
    "tpu.trace_start"() <{level = 10 : i32, message = "bqk,bkd->bqd"}> : () -> ()
    %cst_41 = arith.constant dense<0.000000e+00> : vector<2x8x16xf32>
    %97 = tpu.matmul %93, %81, %cst_41 {dimension_numbers = #tpu.dot_dimension_numbers<[2], [1], [1], [2], [0, 0, 0, 1, 1, 2], [0], [0]>} : vector<2x8x8xf32>, vector<2x8x16xf32>, vector<2x8x16xf32> -> vector<2x8x16xf32>
    "tpu.trace_stop"() : () -> ()
    %98 = vector.shape_cast %97 : vector<2x8x16xf32> to vector<16x16xf32>
    %99 = vector.extract_strided_slice %6 {offsets = [64, 0], sizes = [16, 32], strides = [1, 1]} : vector<96x192xf32> to vector<16x32xf32>
    %cst_42 = arith.constant dense<0.000000e+00> : vector<16x32xf32>
    %100 = tpu.matmul %98, %99, %cst_42 {dimension_numbers = #tpu.dot_dimension_numbers<[1], [0], [0], [1], [0, 0, 1, 1], [], []>} : vector<16x16xf32>, vector<16x32xf32>, vector<16x32xf32> -> vector<16x32xf32>
    %101 = arith.addf %75, %100 : vector<16x32xf32>
    %102 = vector.extract_strided_slice %16 {offsets = [0, 48], sizes = [16, 16], strides = [1, 1]} : vector<48x192xf32> to vector<16x16xf32>
    %103 = vector.shape_cast %102 : vector<16x16xf32> to vector<2x8x16xf32>
    %104 = vector.extract_strided_slice %16 {offsets = [16, 112], sizes = [16, 16], strides = [1, 1]} : vector<48x192xf32> to vector<16x16xf32>
    %105 = vector.shape_cast %104 : vector<16x16xf32> to vector<2x8x16xf32>
    %106 = vector.extract_strided_slice %16 {offsets = [32, 176], sizes = [16, 16], strides = [1, 1]} : vector<48x192xf32> to vector<16x16xf32>
    %107 = vector.shape_cast %106 : vector<16x16xf32> to vector<2x8x16xf32>
    "tpu.trace_start"() <{level = 10 : i32, message = "bqd,bkd->bqk"}> : () -> ()
    %cst_43 = arith.constant dense<0.000000e+00> : vector<2x8x8xf32>
    %108 = tpu.matmul %103, %105, %cst_43 {dimension_numbers = #tpu.dot_dimension_numbers<[2], [2], [1], [1], [0, 0, 0, 1, 1, 1], [0], [0]>} : vector<2x8x16xf32>, vector<2x8x16xf32>, vector<2x8x8xf32> -> vector<2x8x8xf32>
    "tpu.trace_stop"() : () -> ()
    %109 = arith.addf %108, %22 : vector<2x8x8xf32>
    %cst_44 = arith.constant dense<0xFF800000> : vector<2x8xf32>
    %110 = vector.multi_reduction <maximumf>, %109, %cst_44 [2] : vector<2x8x8xf32> to vector<2x8xf32>
    %111 = vector.shape_cast %110 : vector<2x8xf32> to vector<2x8x1xf32>
    %112 = vector.broadcast %111 : vector<2x8x1xf32> to vector<2x8x8xf32>
    %113 = arith.subf %109, %112 : vector<2x8x8xf32>
    %114 = math.exp %113 : vector<2x8x8xf32>
    %cst_45 = arith.constant dense<0.000000e+00> : vector<2x8xf32>
    %115 = vector.multi_reduction <add>, %114, %cst_45 [2] : vector<2x8x8xf32> to vector<2x8xf32>
    %116 = vector.shape_cast %115 : vector<2x8xf32> to vector<2x8x1xf32>
    %117 = tpu.reciprocal %116 : vector<2x8x1xf32> -> vector<2x8x1xf32>
    %118 = vector.broadcast %117 : vector<2x8x1xf32> to vector<2x8x8xf32>
    %119 = arith.mulf %114, %118 : vector<2x8x8xf32>
    %c0_46 = arith.constant 0 : index
    %c3 = arith.constant 3 : index
    %c0_47 = arith.constant 0 : index
    %c0_48 = arith.constant 0 : index
    %120 = vector.load %arg8[%c0_46, %c3, %c0_47, %c0_48] : memref<2x4x8x8xf32, #tpu.memory_space<vmem>>, vector<2x1x8x8xf32>
    %121 = vector.shape_cast %120 : vector<2x1x8x8xf32> to vector<2x8x8xf32>
    %122 = vector.shape_cast %119 : vector<2x8x8xf32> to vector<2x1x8x8xf32>
    tpu.vector_store %arg8[%c0_46, %c3, %c0_47, %c0_48], %122 {strides = array<i32>} : memref<2x4x8x8xf32, #tpu.memory_space<vmem>>, vector<2x1x8x8xf32>,
    "tpu.trace_start"() <{level = 10 : i32, message = "bqk,bkd->bqd"}> : () -> ()
    %cst_49 = arith.constant dense<0.000000e+00> : vector<2x8x16xf32>
    %123 = tpu.matmul %119, %107, %cst_49 {dimension_numbers = #tpu.dot_dimension_numbers<[2], [1], [1], [2], [0, 0, 0, 1, 1, 2], [0], [0]>} : vector<2x8x8xf32>, vector<2x8x16xf32>, vector<2x8x16xf32> -> vector<2x8x16xf32>
    "tpu.trace_stop"() : () -> ()
    %124 = vector.shape_cast %123 : vector<2x8x16xf32> to vector<16x16xf32>
    %125 = vector.extract_strided_slice %6 {offsets = [80, 0], sizes = [16, 32], strides = [1, 1]} : vector<96x192xf32> to vector<16x32xf32>
    %cst_50 = arith.constant dense<0.000000e+00> : vector<16x32xf32>
    %126 = tpu.matmul %124, %125, %cst_50 {dimension_numbers = #tpu.dot_dimension_numbers<[1], [0], [0], [1], [0, 0, 1, 1], [], []>} : vector<16x16xf32>, vector<16x32xf32>, vector<16x32xf32> -> vector<16x32xf32>
    %127 = arith.addf %101, %126 : vector<16x32xf32>
    %128 = vector.broadcast %10 : vector<1x32xf32> to vector<16x32xf32>
    %129 = arith.addf %127, %128 : vector<16x32xf32>
    %130 = arith.addf %129, %1 : vector<16x32xf32>
    %cst_51 = arith.constant dense<0.000000e+00> : vector<16xf32>
    %131 = vector.multi_reduction <add>, %130, %cst_51 [1] : vector<16x32xf32> to vector<16xf32>
    %132 = vector.shape_cast %131 : vector<16xf32> to vector<16x1xf32>
    %cst_52 = arith.constant 3.200000e+01 : f32
    %133 = vector.broadcast %cst_52 : f32 to vector<16x1xf32>
    %134 = arith.divf %132, %133 : vector<16x1xf32>
    %135 = vector.broadcast %134 : vector<16x1xf32> to vector<16x32xf32>
    %136 = arith.subf %130, %135 : vector<16x32xf32>
    %137 = arith.mulf %136, %136 : vector<16x32xf32>
    %cst_53 = arith.constant dense<0.000000e+00> : vector<16xf32>
    %138 = vector.multi_reduction <add>, %137, %cst_53 [1] : vector<16x32xf32> to vector<16xf32>
    %139 = vector.shape_cast %138 : vector<16xf32> to vector<16x1xf32>
    %cst_54 = arith.constant 3.200000e+01 : f32
    %140 = vector.broadcast %cst_54 : f32 to vector<16x1xf32>
    %141 = arith.divf %139, %140 : vector<16x1xf32>
    %142 = vector.broadcast %134 : vector<16x1xf32> to vector<16x32xf32>
    %143 = arith.subf %130, %142 : vector<16x32xf32>
    %cst_55 = arith.constant 9.99999974E-6 : f32
    %144 = vector.broadcast %cst_55 : f32 to vector<16x1xf32>
    %145 = arith.addf %141, %144 : vector<16x1xf32>
    %146 = math.rsqrt %145 : vector<16x1xf32>
    %147 = vector.broadcast %146 : vector<16x1xf32> to vector<16x32xf32>
    %148 = arith.mulf %143, %147 : vector<16x32xf32>
    %149 = vector.broadcast %11 : vector<1x32xf32> to vector<16x32xf32>
    %150 = arith.mulf %148, %149 : vector<16x32xf32>
    %151 = vector.broadcast %12 : vector<1x32xf32> to vector<16x32xf32>
    %152 = arith.addf %150, %151 : vector<16x32xf32>
    %153 = vector.shape_cast %152 : vector<16x32xf32> to vector<2x8x32xf32>
    %c0_56 = arith.constant 0 : index
    %c0_57 = arith.constant 0 : index
    %c0_58 = arith.constant 0 : index
    %154 = vector.load %arg7[%c0_56, %c0_57, %c0_58] : memref<2x8x32xf32, #tpu.memory_space<vmem>>, vector<2x8x32xf32>
    tpu.vector_store %arg7[%c0_56, %c0_57, %c0_58], %153 {strides = array<i32>} : memref<2x8x32xf32, #tpu.memory_space<vmem>>, vector<2x8x32xf32>,
    return
  }
  func.func @transform_0(%arg0: i32) -> (i32, i32, i32) {
    %c0_i32 = arith.constant 0 : i32
    %c0_i32_0 = arith.constant 0 : i32
    %c0_i32_1 = arith.constant 0 : i32
    return %arg0, %c0_i32, %c0_i32_0 : i32, i32, i32
  }
  func.func @transform_1(%arg0: i32) -> (i32, i32, i32) {
    %c0_i32 = arith.constant 0 : i32
    %c0_i32_0 = arith.constant 0 : i32
    %c0_i32_1 = arith.constant 0 : i32
    return %arg0, %c0_i32, %c0_i32_0 : i32, i32, i32
  }
  func.func @transform_2(%arg0: i32) -> (i32, i32, i32) {
    %c0_i32 = arith.constant 0 : i32
    %c0_i32_0 = arith.constant 0 : i32
    %c0_i32_1 = arith.constant 0 : i32
    return %arg0, %c0_i32, %c0_i32_0 : i32, i32, i32
  }
  func.func @transform_3(%arg0: i32) -> (i32, i32, i32) {
    %c0_i32 = arith.constant 0 : i32
    %c0_i32_0 = arith.constant 0 : i32
    %c0_i32_1 = arith.constant 0 : i32
    return %arg0, %c0_i32, %c0_i32_0 : i32, i32, i32
  }
  func.func @transform_4(%arg0: i32) -> (i32, i32) {
    %c0_i32 = arith.constant 0 : i32
    %c0_i32_0 = arith.constant 0 : i32
    %c0_i32_1 = arith.constant 0 : i32
    return %c0_i32, %c0_i32_0 : i32, i32
  }
  func.func @transform_5(%arg0: i32) -> (i32, i32) {
    %c0_i32 = arith.constant 0 : i32
    %c0_i32_0 = arith.constant 0 : i32
    %c0_i32_1 = arith.constant 0 : i32
    return %c0_i32, %c0_i32_0 : i32, i32
  }
  func.func @transform_6(%arg0: i32) -> (i32, i32, i32) {
    %c0_i32 = arith.constant 0 : i32
    %c0_i32_0 = arith.constant 0 : i32
    %c0_i32_1 = arith.constant 0 : i32
    return %arg0, %c0_i32, %c0_i32_0 : i32, i32, i32
  }
  func.func @transform_7(%arg0: i32) -> (i32, i32, i32, i32) {
    %c0_i32 = arith.constant 0 : i32
    %c0_i32_0 = arith.constant 0 : i32
    %c0_i32_1 = arith.constant 0 : i32
    %c0_i32_2 = arith.constant 0 : i32
    return %arg0, %c0_i32, %c0_i32_0, %c0_i32_1 : i32, i32, i32, i32
  }
}

</mosaic_0001>

<bundles_post_ra>
// kernel: multi_head_attention.1
= control target key start
LH: loop header
LB: loop body
LE: loop exit
PB: predicated region body
PF: predicated region fallthrough
CT: control target
= control target key end

     0   :  { %13 = vsyncpa [#allocation3], 0  ;;  %s1688_s0 = inlined_call_operand.hbm [shape: f32[2,8,32], index: 0, kind: input, shape index: {}]   ;;  %s1689_s1 = inlined_call_operand.hbm [shape: f32[2,8,32], index: 1, kind: input, shape index: {}]   ;;  %s1690_s2 = inlined_call_operand.hbm [shape: f32[2,8,32], index: 2, kind: input, shape index: {}]   ;;  %s1691_s3 = inlined_call_operand.hbm [shape: s32[2,8,8], index: 3, kind: input, shape index: {}]   ;;  %s1692_s4 = inlined_call_operand.hbm [shape: f32[96,192], index: 4, kind: input, shape index: {}]   ;;  %s1693_s5 = inlined_call_operand.hbm [shape: f32[8,192], index: 5, kind: input, shape index: {}]   ;;  %s1694_s6 = inlined_call_operand.hbm [shape: f32[2,8,32], index: 6, kind: output, shape index: {0}]   ;;  %s1695_s7 = inlined_call_operand.hbm [shape: f32[2,4,8,8], index: 7, kind: output, shape index: {1}]  }
   0x1   :  { %14 = vsyncpa [#allocation6], 0 }
   0x2   :  { %15 = vsyncpa [#allocation9], 0 }
   0x3   :  { %16 = vsyncpa [#allocation12], 0 }
   0x4   :  { %17 = vsyncpa [#allocation4], 0 }
   0x5   :  { %18 = vsyncpa [#allocation15], 0  ;;  %s36_s26 = sshll.u32 %s1689_s1, 4  ;;  %s1406_s27 = smov [#allocation5]   ;;  %s37_s26 = int_to_ptr.hbm [resolvable:$true] %s36_s26 }
   0x6   :  { %s38_s28 = sshll.u32 %s1406_s27, 4  ;;  %s62_s8 = sshll.u32 %s1691_s3, 4  ;;  %s39_s28 = int_to_ptr.vmem [resolvable:$true] %s38_s28  ;;  %s63_s8 = int_to_ptr.hbm [resolvable:$true] %s62_s8 }
   0x7   :  { %s1407_s9 = smov 128   ;;  %s1408_s10 = smov 8  }
   0x8   :  { %44 = dma.hbm_to_vmem [thread:$0]  %s37_s26, 256, %s39_s28, [#allocation6], %s1407_s9, %s1407_s9, %s1408_s10  }
   0x9   :  { %s1409_s11 = smov [#allocation8]   ;;  %s23_s1 = sshll.u32 %s1688_s0, 4  ;;  %s24_s1 = int_to_ptr.hbm [resolvable:$true] %s23_s1 }
   0xa   :  { %s64_s12 = sshll.u32 %s1409_s11, 4  ;;  %s49_s16 = sshll.u32 %s1690_s2, 4  ;;  %s65_s12 = int_to_ptr.vmem [resolvable:$true] %s64_s12  ;;  %s50_s16 = int_to_ptr.hbm [resolvable:$true] %s49_s16 }
   0xb   :  { %70 = dma.hbm_to_vmem [thread:$0]  %s63_s8, 256, %s65_s12, [#allocation9], %s1407_s9, %s1407_s9, %s1408_s10  }
   0xc   :  { %s1410_s17 = smov [#allocation2]   ;;  %s1411_s19 = smov [#allocation7]  }
   0xd   :  { %s25_s18 = sshll.u32 %s1410_s17, 4  ;;  %s51_s0 = sshll.u32 %s1411_s19, 4  ;;  %s26_s18 = int_to_ptr.vmem [resolvable:$true] %s25_s18  ;;  %s52_s0 = int_to_ptr.vmem [resolvable:$true] %s51_s0 }
   0xe   :  { %31 = dma.hbm_to_vmem [thread:$0]  %s24_s1, 256, %s26_s18, [#allocation3], %s1407_s9, %s1407_s9, %s1408_s10  }
   0xf   :  { %s75_s22 = sshll.u32 %s1692_s4, 4  ;;  %s1412_s2 = smov [#allocation10]   ;;  %s76_s22 = int_to_ptr.hbm [resolvable:$true] %s75_s22 }
  0x10   :  { %57 = dma.hbm_to_vmem [thread:$0]  %s50_s16, 256, %s52_s0, [#allocation6], %s1407_s9, %s1407_s9, %s1408_s10  }
  0x11   :  { %s77_s23 = sshll.u32 %s1412_s2, 4  ;;  %s89_s26 = sshll.u32 %s1693_s5, 4  ;;  %s78_s23 = int_to_ptr.vmem [resolvable:$true] %s77_s23  ;;  %s90_s26 = int_to_ptr.hbm [resolvable:$true] %s89_s26 }
  0x12   :  { %s1413_s27 = smov 256   ;;  %s1414_s28 = smov 16  }
  0x13   :  { %83 = dma.hbm_to_vmem [thread:$0]  %s76_s22, 3072, %s78_s23, [#allocation9], %s1413_s27, %s1413_s27, %s1414_s28  }
  0x14   :  { %s1415_s29 = smov [#allocation11]  }
  0x15   :  { %s91_s4 = sshll.u32 %s1415_s29, 4  ;;  %s92_s4 = int_to_ptr.vmem [resolvable:$true] %s91_s4 }
  0x16   :  { %94 = dma.hbm_to_vmem [thread:$0]  %s90_s26, 256, %s92_s4, [#allocation12]  }
  0x17   :  { %1394 = dma.done.wait [#allocation3], 256  }
  0x18   :  { %1395 = vsyncadd [#allocation3], 4294967040 }
  0x19   :  { %1396 = dma.done.wait [#allocation6], 512  }
  0x1a   :  { %1397 = vsyncadd [#allocation6], 4294966784 }
  0x1b   :  { %1398 = dma.done.wait [#allocation9], 3328  }
  0x1c   :  { %1399 = vsyncadd [#allocation9], 4294963968 }
  0x1d   :  { %1400 = dma.done.wait [#allocation12], 256  }
  0x1e   :  { %1401 = vsyncadd [#allocation12], 4294967040  ;;  %v131_v0 = vld [vmem:[#allocation10 + $0x30] sm:$0xff]  ;;  %v129_v1 = vld [vmem:[#allocation10 + $0x20] sm:$0xff]  ;;  %vm145_vm0 = vcmask 261120   ;;  %s1416_s5 = smov 64  }
  0x1f   :  { %176 = vmatpush.msra.mxu0 %v131_v0  ;;  %1135 = vmatpush.msra.mxu1 %v131_v0  ;;  %v127_v2 = vld [vmem:[#allocation10 + $0x10] sm:$0xff]  ;;  %v125_v3 = vld [vmem:[#allocation10] sm:$0xff]  ;;  %v124_v5 = vld [vmem:[#allocation7 + $0x8] sm:$0xff]  ;;  %s1417_s30 = smov 48   ;;  %s1418_s8 = smov 112   ;;  %vm237_vm1 = vcmask 130048  }
  0x20   :  { %v1497_v4 = vld [vmem:[#allocation2] sm:$0xff]  ;;  %v132_v6 = vld [vmem:[#allocation10 + $0x38] sm:$0xff]  ;;  %v130_v7 = vld [vmem:[#allocation10 + $0x28] sm:$0xff]  ;;  %v1419_v38 = vmov 0.0   ;;  %vm291_vm3 = vcmask 64512   ;;  %s1420_s11 = smov 32  }
  0x21   :  { %177 = vmatpush.msra.mxu0 %v129_v1  ;;  %1136 = vmatpush.msra.mxu1 %v129_v1  ;;  %v128_v8 = vld [vmem:[#allocation10 + $0x18] sm:$0xff]  ;;  %v126_v9 = vld [vmem:[#allocation10 + $0x8] sm:$0xff]  ;;  %v121_v11 = vld [vmem:[#allocation5] sm:$0xff]  ;;  %s1421_s12 = smov 96   ;;  %s1422_s13 = smov 80  }
  0x22   :  { %v1502_v10 = vld [vmem:[#allocation2 + $0x8] sm:$0xff]  ;;  %v122_v12 = vld [vmem:[#allocation5 + $0x8] sm:$0xff]  ;;  %v123_v13 = vld [vmem:[#allocation7] sm:$0xff]  ;;  %s1424_s14 = smov [#allocation14]   ;;  %s1070_s16 = sshll.u32 %s1695_s7, 4  ;;  %s1071_s16 = int_to_ptr.hbm [resolvable:$true] %s1070_s16 }
  0x23   :  { %178 = vmatpush.msra.mxu0 %v127_v2  ;;  %1137 = vmatpush.msra.mxu1 %v127_v2  ;;  %v1516_v14 = vld [vmem:[#allocation11] sm:$0xff]  ;;  %v142_v30 = vld [vmem:[#allocation11 + $0x8] sm:$0xff]  ;;  %v228_v37 = vld [vmem:[#allocation8] sm:$0xff]  ;;  %s1068_s1 = sshll.u32 %s1424_s14, 4  ;;  %s1425_s7 = smov [#allocation13]   ;;  %s1069_s1 = int_to_ptr.vmem [resolvable:$true] %s1068_s1 }
  0x24   :  { %v143_v15 = vperm.slane %v1516_v14, 0  ;;  %v144_v31 = vperm.slane %v142_v30, 0  ;;  %vm230_vm2 = vcmp.ne.s32.totalorder %v228_v37, 0  ;;  %v229_v41 = vld [vmem:[#allocation8 + $0x8] sm:$0xff]  ;;  %s1055_s17 = sshll.u32 %s1425_s7, 4  ;;  %s1057_s0 = sshll.u32 %s1694_s6, 4  ;;  %s1056_s17 = int_to_ptr.vmem [resolvable:$true] %s1055_s17  ;;  %s1058_s0 = int_to_ptr.hbm [resolvable:$true] %s1057_s0 }
  0x25   :  { %179 = vmatpush.msra.mxu0 %v125_v3  ;;  %1138 = vmatpush.msra.mxu1 %v125_v3  ;;  %v1544_v39 = vsel %vm230_vm2, -1e+09, %v1419_v38  ;;  %vm231_vm4 = vcmp.ne.s32.totalorder %v229_v41, 0 }
  0x26   :  { %1091 = vmatmul.msk.f32.vlgmr.msra.gmra.mxu0 %vm145_vm0, %v1497_v4  ;;  %1096 = vmatmul.msk.f32.vlgmr.msra.gmra.mxu1 %vm145_vm0, %v124_v5  ;;  %v1548_v44 = vsel %vm231_vm4, -1e+09, %v1419_v38 }
  0x27   :  { %209 = vmatpush.msrb.mxu1 %v132_v6 }
  0x29   :  { %210 = vmatpush.msrb.mxu1 %v130_v7 }
  0x2b   :  { %211 = vmatpush.msrb.mxu1 %v128_v8 }
  0x2d   :  { %212 = vmatpush.msrb.mxu1 %v126_v9 }
  0x2e   :  { %1092 = vmatmul.msk.f32.gmra.mxu0 %vm145_vm0, %v1502_v10  ;;  %1097 = vmatmul.msk.f32.vlgmr.msrb.gmra.mxu1 %vm145_vm0, %v1497_v4 }
  0x36   :  { %1093 = vmatmul.msk.f32.gmra.mxu0 %vm145_vm0, %v121_v11  ;;  %1098 = vmatmul.msk.f32.gmra.mxu1 %vm145_vm0, %v1502_v10 }
  0x3e   :  { %1094 = vmatmul.msk.f32.gmra.mxu0 %vm145_vm0, %v122_v12  ;;  %1099 = vmatmul.msk.f32.gmra.mxu1 %vm145_vm0, %v121_v11 }
  0x46   :  { %1100 = vmatmul.msk.f32.gmra.mxu1 %vm145_vm0, %v122_v12  ;;  %1095 = vmatmul.msk.f32.gmra.mxu0 %vm145_vm0, %v123_v13 }
  0x4e   :  { %1101 = vmatmul.msk.f32.gmra.mxu1 %vm145_vm0, %v123_v13 }
  0x56   :  { %1102 = vmatmul.msk.f32.gmra.mxu1 %vm145_vm0, %v124_v5 }
  0xa3   :  { %v181_v16 = vpop.f32.mrf.mxu0  ;;  %v195_v17 = vpop.f32.mrf.mxu1 }
  0xa4   :  { %v1520_v18 = vadd.f32 %v181_v16, %v143_v15 }
  0xab   :  { %v184_v19 = vpop.f32.mrf.mxu0  ;;  %v214_v20 = vpop.f32.mrf.mxu1 }
  0xac   :  { %v1530_v28 = vadd.f32 %v184_v19, %v143_v15 }
  0xb3   :  { %v187_v21 = vpop.f32.mrf.mxu0  ;;  %v216_v22 = vpop.f32.mrf.mxu1 }
  0xb4   :  { %v1522_v23 = vadd.f32 %v187_v21, %v143_v15 }
  0xb6   :  { %235 = vrot.lane.b32.xlu0 %v1522_v23, %s1416_s5 }
  0xbb   :  { %v190_v24 = vpop.f32.mrf.mxu0  ;;  %v218_v25 = vpop.f32.mrf.mxu1 }
  0xbc   :  { %v1525_v26 = vadd.f32 %v190_v24, %v143_v15 }
  0xbe   :  { %264 = vrot.lane.b32.xlu0 %v1525_v26, %s1416_s5 }
  0xc3   :  { %v220_v27 = vpop.f32.mrf.mxu1  ;;  %v193_v29 = vpop.f32.mrf.mxu0 }
  0xc6   :  { %390 = vrot.lane.b32.xlu0 %v1522_v23, %s1417_s30 }
  0xcb   :  { %v222_v32 = vpop.f32.mrf.mxu1 }
  0xcc   :  { %v1534_v33 = vadd.f32 %v222_v32, %v144_v31 }
  0xce   :  { %416 = vrot.lane.b32.xlu0 %v1530_v28, %s1418_s8 }
  0xd3   :  { %v225_v58 = vpop.f32.mrf.mxu1 }
  0xd4   :  { %v1558_v59 = vadd.f32 %v225_v58, %v144_v31 }
 0x128   :  { %v236_v34 = vpop.permute.xlu0 %235 }
 0x129   :  { %1103 = vmatpush.xpose.msk.msra.mxu2 %vm237_vm1, %v236_v34 }
 0x12c   :  { %1104 = vmatmul.msk.f32.vlgmr.msra.gmra.mxu2 %vm237_vm1, %v1520_v18 }
 0x12d   :  { %360 = vmatpush.msrb.mxu2 %v1534_v33 }
 0x130   :  { %v265_v35 = vpop.permute.xlu0 %264 }
 0x131   :  { %1105 = vmatpush.xpose.msk.msra.mxu3 %vm237_vm1, %v265_v35 }
 0x134   :  { %1106 = vmatmul.msk.f32.vlgmr.msra.gmra.mxu3 %vm237_vm1, %v1530_v28 }
 0x135   :  { %383 = vmatpush.msrb.mxu3 %v1558_v59 }
 0x138   :  { %v391_v36 = vpop.permute.xlu0 %390 }
 0x139   :  { %1109 = vmatpush.xpose.msk.msra.mxu2 %vm237_vm1, %v391_v36 }
 0x140   :  { %v417_v29 = vpop.permute.xlu0 %416 }
 0x1af   :  { %v260_v40 = vpop.f32.mrf.mxu2 }
 0x1b0   :  { %v261_v42 = vadd.f32 %v260_v40, %v1544_v39 }
 0x1b2   :  { %v292_v43 = vsel %vm291_vm3, %v261_v42, -inf }
 0x1b3   :  { %293 = vmax.xlane.f32.xlu1 %v292_v43 }
 0x1b7   :  { %v288_v45 = vpop.f32.mrf.mxu3 }
 0x1b8   :  { %v289_v46 = vadd.f32 %v288_v45, %v1548_v44 }
 0x1ba   :  { %v295_v47 = vsel %vm291_vm3, %v289_v46, -inf }
 0x1bb   :  { %296 = vmax.xlane.f32.xlu1 %v295_v47 }
 0x1d4   :  { %388 = vrot.lane.b32.xlu1 %v1520_v18, %s1418_s8 }
 0x226   :  { %v294_v48 = vpop.xlane.xlu1 %293 }
 0x227   :  { %v298_v49 = vsub.f32 %v261_v42, %v294_v48 }
 0x229   :  { %v300_v50 = vmul.f32 1.442695, %v298_v49 }
 0x22b   :  { %1164 = vpow2.f32 %v300_v50 }
 0x22e   :  { %v297_v51 = vpop.xlane.xlu1 %296 }
 0x22f   :  { %v299_v52 = vsub.f32 %v289_v46, %v297_v51 }
 0x231   :  { %v1165_v53 = vpop.eup %1164  ;;  %v302_v54 = vmul.f32 1.442695, %v299_v52  ;;  %v136_v52 = vld [vmem:[#allocation10 + $0x70] sm:$0xff] }
 0x232   :  { %v304_v55 = vsel %vm291_vm3, %v1165_v53, 0.0 }
 0x233   :  { %1166 = vpow2.f32 %v302_v54  ;;  %305 = vadd.xlane.f32.xlu2 %v304_v55 }
 0x239   :  { %v1167_v56 = vpop.eup %1166 }
 0x23a   :  { %v307_v57 = vsel %vm291_vm3, %v1167_v56, 0.0 }
 0x23b   :  { %308 = vadd.xlane.f32.xlu2 %v307_v57 }
 0x246   :  { %v389_v27 = vpop.permute.xlu1 %388 }
 0x253   :  { %418 = vrot.lane.b32.xlu2 %v1525_v26, %s1417_s30 }
 0x2a6   :  { %v306_v60 = vpop.xlane.xlu2 %305 }
 0x2a7   :  { %1168 = vrcp.f32 %v306_v60  ;;  %v321_v1 = vand.u32 2147483648, %v306_v60  ;;  %v319_v3 = vand.u32 2147483647, %v306_v60  ;;  %vm315_vm6 = vweird.f32 %v306_v60 }
 0x2a9   :  { %v322_v7 = vor.u32 1.1754944e-38, %v321_v1  ;;  %vm320_vm8 = vcmp.eq.f32.partialorder %v319_v3, 8.507059e+37 }
 0x2ad   :  { %v1169_v61 = vpop.eup %1168 }
 0x2ae   :  { %v311_v62 = vmul.f32 %v1169_v61, %v306_v60  ;;  %v309_v63 = vpop.xlane.xlu2 %308  ;;  %vm316_vm5 = vweird.f32 %v1169_v61 }
 0x2af   :  { %1170 = vrcp.f32 %v309_v63  ;;  %vm317_vm7 = vmor %vm315_vm6, %vm316_vm5  ;;  %v335_v16 = vand.u32 2147483648, %v309_v63  ;;  %v333_v19 = vand.u32 2147483647, %v309_v63  ;;  %vm329_vm10 = vweird.f32 %v309_v63 }
 0x2b0   :  { %v312_v0 = vsub.f32 1.0, %v311_v62 }
 0x2b1   :  { %v336_v21 = vor.u32 1.1754944e-38, %v335_v16  ;;  %vm334_vm12 = vcmp.eq.f32.partialorder %v333_v19, 8.507059e+37  ;;  %v133_v19 = vld [vmem:[#allocation10 + $0x40] sm:$0xff] }
 0x2b2   :  { %v313_v2 = vmul.f32 %v1169_v61, %v312_v0 }
 0x2b4   :  { %v314_v5 = vadd.f32 %v1169_v61, %v313_v2 }
 0x2b5   :  { %v1171_v6 = vpop.eup %1170 }
 0x2b6   :  { %v325_v8 = vmul.f32 %v1171_v6, %v309_v63  ;;  %v419_v9 = vpop.permute.xlu2 %418  ;;  %v318_v11 = vsel %vm317_vm7, %v1169_v61, %v314_v5  ;;  %vm330_vm9 = vweird.f32 %v1171_v6 }
 0x2b7   :  { %1111 = vmatpush.xpose.msk.msra.mxu3 %vm237_vm1, %v419_v9  ;;  %v323_v12 = vsel %vm320_vm8, %v322_v7, %v318_v11  ;;  %vm331_vm11 = vmor %vm329_vm10, %vm330_vm9 }
 0x2b8   :  { %v326_v13 = vsub.f32 1.0, %v325_v8  ;;  %v338_v15 = vmul.f32 %v1165_v53, %v323_v12  ;;  %v135_v53 = vld [vmem:[#allocation10 + $0x60] sm:$0xff] }
 0x2ba   :  { %v327_v17 = vmul.f32 %v1171_v6, %v326_v13  ;;  %340 = vst.msk [vmem:[#allocation14] sm:$0xff] %vm291_vm3, %v338_v15  ;;  %1107 = vmatmul.msk.f32.vlgmr.msrb.gmra.mxu2 %vm291_vm3, %v338_v15 }
 0x2bc   :  { %v328_v20 = vadd.f32 %v1171_v6, %v327_v17  ;;  %v134_v17 = vld [vmem:[#allocation10 + $0x50] sm:$0xff] }
 0x2be   :  { %v332_v22 = vsel %vm331_vm11, %v1171_v6, %v328_v20 }
 0x2bf   :  { %v337_v24 = vsel %vm334_vm12, %v336_v21, %v332_v22 }
 0x2c0   :  { %v339_v25 = vmul.f32 %v1167_v56, %v337_v24 }
 0x2c2   :  { %341 = vst.msk [vmem:[#allocation14 + $0x20] sm:$0xff] %vm291_vm3, %v339_v25  ;;  %1108 = vmatmul.msk.f32.vlgmr.msrb.gmra.mxu3 %vm291_vm3, %v339_v25  ;;  %1110 = vmatmul.msk.f32.vlgmr.msra.gmra.mxu2 %vm237_vm1, %v389_v27 }
 0x2ca   :  { %1112 = vmatmul.msk.f32.vlgmr.msra.gmra.mxu3 %vm237_vm1, %v417_v29 }
 0x33d   :  { %v1568_v30 = vpop.f32.mrf.mxu2 }
 0x345   :  { %v1570_v31 = vpop.f32.mrf.mxu3  ;;  %v413_v32 = vpop.f32.mrf.mxu2 }
 0x346   :  { %v414_v34 = vadd.f32 %v413_v32, %v1544_v39 }
 0x348   :  { %v444_v35 = vsel %vm291_vm3, %v414_v34, -inf }
 0x349   :  { %445 = vmax.xlane.f32.xlu0 %v444_v35 }
 0x34d   :  { %v441_v36 = vpop.f32.mrf.mxu3 }
 0x34e   :  { %v442_v37 = vadd.f32 %v441_v36, %v1548_v44 }
 0x350   :  { %v447_v38 = vsel %vm291_vm3, %v442_v37, -inf }
 0x351   :  { %448 = vmax.xlane.f32.xlu2 %v447_v38  ;;  %v1159_v38 = vpack.i.bf16 %v1558_v59, %v1534_v33 }
 0x369   :  { %496 = vrot.lane.b32.xlu2 %v1534_v33, %s1418_s8 }
 0x3bc   :  { %v446_v40 = vpop.xlane.xlu0 %445 }
 0x3bd   :  { %v450_v41 = vsub.f32 %v414_v34, %v446_v40 }
 0x3bf   :  { %v452_v42 = vmul.f32 1.442695, %v450_v41 }
 0x3c1   :  { %1172 = vpow2.f32 %v452_v42 }
 0x3c4   :  { %v449_v43 = vpop.xlane.xlu2 %448 }
 0x3c5   :  { %v451_v45 = vsub.f32 %v442_v37, %v449_v43 }
 0x3c7   :  { %v1173_v46 = vpop.eup %1172  ;;  %v454_v47 = vmul.f32 1.442695, %v451_v45 }
 0x3c8   :  { %v456_v48 = vsel %vm291_vm3, %v1173_v46, 0.0 }
 0x3c9   :  { %1174 = vpow2.f32 %v454_v47  ;;  %457 = vadd.xlane.f32.xlu1 %v456_v48 }
 0x3cc   :  { %v497_v49 = vpop.permute.xlu2 %496 }
 0x3cd   :  { %517 = vmatpush.msrb.mxu2 %v497_v49 }
 0x3cf   :  { %v1175_v50 = vpop.eup %1174  ;;  %569 = vmatpush.msra.mxu2 %v136_v52 }
 0x3d0   :  { %v459_v51 = vsel %vm291_vm3, %v1175_v50, 0.0 }
 0x3d1   :  { %460 = vadd.xlane.f32.xlu0 %v459_v51  ;;  %570 = vmatpush.msra.mxu2 %v135_v53 }
 0x3e2   :  { %609 = vrot.lane.b32.xlu1 %v1522_v23, %s1420_s11 }
 0x3e5   :  { %523 = vrot.lane.b32.xlu0 %v1558_v59, %s1418_s8 }
 0x3ed   :  { %607 = vrot.lane.b32.xlu0 %v1520_v18, %s1421_s12 }
 0x3f5   :  { %637 = vrot.lane.b32.xlu0 %v1525_v26, %s1420_s11 }
 0x3fd   :  { %635 = vrot.lane.b32.xlu0 %v1530_v28, %s1421_s12 }
 0x405   :  { %799 = vrot.lane.b32.xlu0 %v1522_v23, %s1414_s28 }
 0x40d   :  { %714 = vrot.lane.b32.xlu0 %v1534_v33, %s1421_s12 }
 0x415   :  { %797 = vrot.lane.b32.xlu0 %v1520_v18, %s1422_s13 }
 0x41d   :  { %825 = vrot.lane.b32.xlu0 %v1530_v28, %s1422_s13 }
 0x43c   :  { %v458_v54 = vpop.xlane.xlu1 %457 }
 0x43d   :  { %1176 = vrcp.f32 %v458_v54  ;;  %v473_v58 = vand.u32 2147483648, %v458_v54  ;;  %v471_v61 = vand.u32 2147483647, %v458_v54  ;;  %vm467_vm14 = vweird.f32 %v458_v54 }
 0x43f   :  { %v474_v28 = vor.u32 1.1754944e-38, %v473_v58  ;;  %vm472_vm2 = vcmp.eq.f32.partialorder %v471_v61, 8.507059e+37 }
 0x443   :  { %v1177_v55 = vpop.eup %1176 }
 0x444   :  { %v463_v56 = vmul.f32 %v1177_v55, %v458_v54  ;;  %v461_v57 = vpop.xlane.xlu0 %460  ;;  %vm468_vm13 = vweird.f32 %v1177_v55 }
 0x445   :  { %1178 = vrcp.f32 %v461_v57  ;;  %vm469_vm15 = vmor %vm467_vm14, %vm468_vm13  ;;  %v487_v5 = vand.u32 2147483648, %v461_v57  ;;  %v485_v7 = vand.u32 2147483647, %v461_v57  ;;  %vm481_vm5 = vweird.f32 %v461_v57 }
 0x446   :  { %v464_v23 = vsub.f32 1.0, %v463_v56 }
 0x447   :  { %v488_v9 = vor.u32 1.1754944e-38, %v487_v5  ;;  %vm486_vm7 = vcmp.eq.f32.partialorder %v485_v7, 8.507059e+37 }
 0x448   :  { %v465_v60 = vmul.f32 %v1177_v55, %v464_v23 }
 0x44a   :  { %v466_v62 = vadd.f32 %v1177_v55, %v465_v60 }
 0x44b   :  { %v1179_v18 = vpop.eup %1178 }
 0x44c   :  { %v470_v63 = vsel %vm469_vm15, %v1177_v55, %v466_v62  ;;  %v477_v0 = vmul.f32 %v1179_v18, %v461_v57  ;;  %vm482_vm4 = vweird.f32 %v1179_v18 }
 0x44d   :  { %v475_v1 = vsel %vm472_vm2, %v474_v28, %v470_v63  ;;  %vm483_vm6 = vmor %vm481_vm5, %vm482_vm4 }
 0x44e   :  { %v478_v2 = vsub.f32 1.0, %v477_v0  ;;  %v490_v3 = vmul.f32 %v1173_v46, %v475_v1 }
 0x450   :  { %v479_v6 = vmul.f32 %v1179_v18, %v478_v2  ;;  %493 = vst.msk [vmem:[#allocation14 + $0x8] sm:$0xff] %vm291_vm3, %v490_v3  ;;  %1113 = vmatmul.msk.f32.vlgmr.msrb.gmra.mxu2 %vm291_vm3, %v490_v3 }
 0x452   :  { %v480_v8 = vadd.f32 %v1179_v18, %v479_v6  ;;  %v138_v6 = vld [vmem:[#allocation10 + $0x90] sm:$0xff] }
 0x454   :  { %v484_v11 = vsel %vm483_vm6, %v1179_v18, %v480_v8  ;;  %v610_v12 = vpop.permute.xlu1 %609 }
 0x455   :  { %v489_v13 = vsel %vm486_vm7, %v488_v9, %v484_v11  ;;  %1119 = vmatpush.xpose.msk.msrb.mxu2 %vm237_vm1, %v610_v12 }
 0x456   :  { %v491_v15 = vmul.f32 %v1175_v50, %v489_v13 }
 0x457   :  { %v524_v16 = vpop.permute.xlu0 %523 }
 0x458   :  { %544 = vmatpush.msrb.mxu3 %v524_v16  ;;  %494 = vst.msk [vmem:[#allocation14 + $0x28] sm:$0xff] %vm291_vm3, %v491_v15 }
 0x459   :  { %1114 = vmatmul.msk.f32.vlgmr.msrb.gmra.mxu3 %vm291_vm3, %v491_v15 }
 0x45a   :  { %598 = vmatpush.msra.mxu3 %v134_v17 }
 0x45c   :  { %599 = vmatpush.msra.mxu3 %v133_v19 }
 0x45f   :  { %v608_v20 = vpop.permute.xlu0 %607 }
 0x461   :  { %1117 = vmatmul.msk.f32.vlgmr.msra.gmra.mxu3 %vm237_vm1, %v1568_v30 }
 0x467   :  { %v638_v21 = vpop.permute.xlu0 %637 }
 0x468   :  { %1121 = vmatpush.xpose.msk.msrb.mxu3 %vm237_vm1, %v638_v21 }
 0x469   :  { %1118 = vmatmul.msk.f32.gmra.mxu3 %vm237_vm1, %v1570_v31 }
 0x46f   :  { %v636_v22 = vpop.permute.xlu0 %635 }
 0x471   :  { %1122 = vmatmul.msk.f32.vlgmr.msrb.gmra.mxu3 %vm237_vm1, %v636_v22  ;;  %v137_v22 = vld [vmem:[#allocation10 + $0x80] sm:$0xff] }
 0x477   :  { %v800_v24 = vpop.permute.xlu0 %799 }
 0x478   :  { %1127 = vmatpush.xpose.msk.msra.mxu3 %vm237_vm1, %v800_v24 }
 0x47f   :  { %v715_v25 = vpop.permute.xlu0 %714 }
 0x480   :  { %735 = vmatpush.msrb.mxu0 %v715_v25 }
 0x487   :  { %v798_v27 = vpop.permute.xlu0 %797 }
 0x488   :  { %1128 = vmatmul.msk.f32.vlgmr.msra.gmra.mxu3 %vm237_vm1, %v798_v27 }
 0x48f   :  { %v826_v46 = vpop.permute.xlu0 %825 }
 0x4d3   :  { %v519_v29 = vpop.f32.mrf.mxu2 }
 0x4d4   :  { %1115 = vmatmul.msk.f32.vlgmr.msra.gmra.mxu2 %vm237_vm1, %v519_v29 }
 0x4d5   :  { %786 = vmatpush.msra.mxu2 %v138_v6  ;;  %v139_v6 = vld [vmem:[#allocation10 + $0xa0] sm:$0xff] }
 0x4d7   :  { %787 = vmatpush.msra.mxu2 %v137_v22 }
 0x4dc   :  { %v546_v30 = vpop.f32.mrf.mxu3 }
 0x4dd   :  { %1116 = vmatmul.msk.f32.gmra.mxu2 %vm237_vm1, %v546_v30 }
 0x4e4   :  { %v1612_v31 = vpop.f32.mrf.mxu3 }
 0x4e5   :  { %1120 = vmatmul.msk.f32.vlgmr.msrb.gmra.mxu2 %vm237_vm1, %v608_v20 }
 0x4ec   :  { %v1614_v32 = vpop.f32.mrf.mxu3 }
 0x4f4   :  { %v660_v34 = vpop.f32.mrf.mxu3 }
 0x4f5   :  { %v661_v57 = vadd.f32 %v660_v34, %v1548_v44 }
 0x4f7   :  { %v666_v23 = vsel %vm291_vm3, %v661_v57, -inf }
 0x50b   :  { %v822_v35 = vpop.f32.mrf.mxu3 }
 0x50c   :  { %v823_v36 = vadd.f32 %v822_v35, %v1544_v39 }
 0x50e   :  { %v853_v37 = vsel %vm291_vm3, %v823_v36, -inf }
 0x50f   :  { %854 = vmax.xlane.f32.xlu0 %v853_v37 }
 0x523   :  { %1160 = vrot.lane.b32.xlu0 %v1159_v38, %s1422_s13 }
 0x557   :  { %v1621_v40 = vpop.f32.mrf.mxu2 }
 0x560   :  { %v1623_v41 = vpop.f32.mrf.mxu2 }
 0x568   :  { %v632_v42 = vpop.f32.mrf.mxu2 }
 0x569   :  { %v633_v43 = vadd.f32 %v632_v42, %v1544_v39 }
 0x56b   :  { %v663_v45 = vsel %vm291_vm3, %v633_v43, -inf }
 0x56c   :  { %664 = vmax.xlane.f32.xlu2 %v663_v45 }
 0x582   :  { %v855_v47 = vpop.xlane.xlu0 %854 }
 0x583   :  { %v859_v49 = vsub.f32 %v823_v36, %v855_v47 }
 0x584   :  { %827 = vrot.lane.b32.xlu2 %v1525_v26, %s1414_s28 }
 0x585   :  { %v861_v50 = vmul.f32 1.442695, %v859_v49 }
 0x587   :  { %1180 = vpow2.f32 %v861_v50 }
 0x58d   :  { %v1181_v51 = vpop.eup %1180 }
 0x58e   :  { %v865_v52 = vsel %vm291_vm3, %v1181_v51, 0.0 }
 0x595   :  { %v1629_v48 = vpop.permute.xlu0 %1160 }
 0x596   :  { %v1163_v33 = vunpack.i.h.bf16 %v1629_v48 }
 0x598   :  { %951 = vmatpush.msrb.mxu3 %v1163_v33 }
 0x5ad   :  { %866 = vadd.xlane.f32.xlu2 %v865_v52 }
 0x5df   :  { %v665_v39 = vpop.xlane.xlu2 %664 }
 0x5e0   :  { %v669_v53 = vsub.f32 %v633_v43, %v665_v39 }
 0x5e2   :  { %v671_v54 = vmul.f32 1.442695, %v669_v53 }
 0x5e4   :  { %1182 = vpow2.f32 %v671_v54 }
 0x5e7   :  { %v828_v55 = vpop.permute.xlu2 %827 }
 0x5e8   :  { %1129 = vmatpush.xpose.msk.msra.mxu0 %vm237_vm1, %v828_v55 }
 0x5ea   :  { %v1183_v26 = vpop.eup %1182 }
 0x5eb   :  { %v675_v56 = vsel %vm291_vm3, %v1183_v26, 0.0 }
 0x5ec   :  { %676 = vadd.xlane.f32.xlu1 %v675_v56 }
 0x5f4   :  { %667 = vmax.xlane.f32.xlu1 %v666_v23 }
 0x620   :  { %v867_v58 = vpop.xlane.xlu2 %866 }
 0x621   :  { %1184 = vrcp.f32 %v867_v58  ;;  %v882_v18 = vand.u32 2147483648, %v867_v58  ;;  %v880_v63 = vand.u32 2147483647, %v867_v58  ;;  %vm876_vm9 = vweird.f32 %v867_v58 }
 0x623   :  { %v883_v1 = vor.u32 1.1754944e-38, %v882_v18  ;;  %vm881_vm11 = vcmp.eq.f32.partialorder %v880_v63, 8.507059e+37 }
 0x627   :  { %v1185_v60 = vpop.eup %1184 }
 0x628   :  { %v872_v61 = vmul.f32 %v1185_v60, %v867_v58  ;;  %vm877_vm8 = vweird.f32 %v1185_v60 }
 0x629   :  { %vm878_vm10 = vmor %vm876_vm9, %vm877_vm8 }
 0x62a   :  { %v873_v62 = vsub.f32 1.0, %v872_v61 }
 0x62c   :  { %v874_v28 = vmul.f32 %v1185_v60, %v873_v62 }
 0x62e   :  { %v875_v0 = vadd.f32 %v1185_v60, %v874_v28 }
 0x630   :  { %v879_v2 = vsel %vm878_vm10, %v1185_v60, %v875_v0 }
 0x631   :  { %v884_v3 = vsel %vm881_vm11, %v883_v1, %v879_v2  ;;  %v1162_v2 = vunpack.i.l.bf16 %v1629_v48 }
 0x632   :  { %v1637_v5 = vmul.f32 %v1181_v51, %v884_v3  ;;  %v140_v3 = vld [vmem:[#allocation10 + $0xb0] sm:$0xff] }
 0x634   :  { %902 = vst.msk [vmem:[#allocation14 + $0x18] sm:$0xff] %vm291_vm3, %v1637_v5 }
 0x65f   :  { %v677_v7 = vpop.xlane.xlu1 %676 }
 0x660   :  { %1186 = vrcp.f32 %v677_v7  ;;  %v692_v12 = vand.u32 2147483648, %v677_v7  ;;  %v690_v15 = vand.u32 2147483647, %v677_v7  ;;  %vm686_vm13 = vweird.f32 %v677_v7 }
 0x662   :  { %v693_v17 = vor.u32 1.1754944e-38, %v692_v12  ;;  %vm691_vm15 = vcmp.eq.f32.partialorder %v690_v15, 8.507059e+37 }
 0x666   :  { %v1187_v8 = vpop.eup %1186 }
 0x667   :  { %v682_v9 = vmul.f32 %v1187_v8, %v677_v7  ;;  %vm687_vm12 = vweird.f32 %v1187_v8  ;;  %v668_v24 = vpop.xlane.xlu1 %667 }
 0x668   :  { %vm688_vm14 = vmor %vm686_vm13, %vm687_vm12  ;;  %v670_v27 = vsub.f32 %v661_v57, %v668_v24 }
 0x669   :  { %v683_v11 = vsub.f32 1.0, %v682_v9 }
 0x66a   :  { %v673_v29 = vmul.f32 1.442695, %v670_v27 }
 0x66b   :  { %v684_v13 = vmul.f32 %v1187_v8, %v683_v11  ;;  %v602_v11 = vadd.f32 %v1612_v31, %v1621_v40 }
 0x66c   :  { %1188 = vpow2.f32 %v673_v29  ;;  %v1423_v29 = vmov 32.0  }
 0x66d   :  { %v685_v16 = vadd.f32 %v1187_v8, %v684_v13 }
 0x66f   :  { %v689_v19 = vsel %vm688_vm14, %v1187_v8, %v685_v16 }
 0x670   :  { %v694_v20 = vsel %vm691_vm15, %v693_v17, %v689_v19  ;;  %v605_v19 = vadd.f32 %v1614_v32, %v1623_v41 }
 0x671   :  { %v709_v21 = vmul.f32 %v1183_v26, %v694_v20 }
 0x672   :  { %v1189_v36 = vpop.eup %1188 }
 0x673   :  { %712 = vst.msk [vmem:[#allocation14 + $0x10] sm:$0xff] %vm291_vm3, %v709_v21  ;;  %1123 = vmatmul.msk.f32.vlgmr.msrb.gmra.mxu0 %vm291_vm3, %v709_v21  ;;  %v678_v37 = vsel %vm291_vm3, %v1189_v36, 0.0 }
 0x674   :  { %976 = vmatpush.msrb.mxu0 %v140_v3 }
 0x676   :  { %977 = vmatpush.msrb.mxu0 %v139_v6 }
 0x67b   :  { %1130 = vmatmul.msk.f32.vlgmr.msra.gmra.mxu0 %vm237_vm1, %v826_v46 }
 0x6f0   :  { %v737_v25 = vpop.f32.mrf.mxu0 }
 0x6f1   :  { %1125 = vmatmul.msk.f32.vlgmr.msra.gmra.mxu2 %vm237_vm1, %v737_v25 }
 0x6f8   :  { %v850_v30 = vpop.f32.mrf.mxu0 }
 0x6f9   :  { %v851_v34 = vadd.f32 %v850_v30, %v1548_v44 }
 0x6fb   :  { %v856_v35 = vsel %vm291_vm3, %v851_v34, -inf }
 0x6fc   :  { %857 = vmax.xlane.f32.xlu1 %v856_v35 }
 0x704   :  { %679 = vadd.xlane.f32.xlu1 %v678_v37 }
 0x76f   :  { %v858_v38 = vpop.xlane.xlu1 %857 }
 0x770   :  { %v860_v42 = vsub.f32 %v851_v34, %v858_v38 }
 0x772   :  { %v863_v43 = vmul.f32 1.442695, %v860_v42 }
 0x774   :  { %1190 = vpow2.f32 %v863_v43  ;;  %v789_v48 = vpop.f32.mrf.mxu2 }
 0x775   :  { %v795_v12 = vadd.f32 %v789_v48, %v602_v11 }
 0x777   :  { %v680_v45 = vpop.xlane.xlu1 %679 }
 0x778   :  { %1192 = vrcp.f32 %v680_v45  ;;  %v706_v50 = vand.u32 2147483648, %v680_v45  ;;  %v704_v52 = vand.u32 2147483647, %v680_v45  ;;  %vm700_vm4 = vweird.f32 %v680_v45 }
 0x77a   :  { %v1191_v46 = vpop.eup %1190  ;;  %v707_v53 = vor.u32 1.1754944e-38, %v706_v50  ;;  %vm705_vm6 = vcmp.eq.f32.partialorder %v704_v52, 8.507059e+37 }
 0x77b   :  { %v868_v47 = vsel %vm291_vm3, %v1191_v46, 0.0 }
 0x77c   :  { %869 = vadd.xlane.f32.xlu1 %v868_v47 }
 0x77e   :  { %v1193_v33 = vpop.eup %1192 }
 0x77f   :  { %v696_v44 = vmul.f32 %v1193_v33, %v680_v45  ;;  %vm701_vm2 = vweird.f32 %v1193_v33 }
 0x780   :  { %vm702_vm5 = vmor %vm700_vm4, %vm701_vm2 }
 0x781   :  { %v697_v49 = vsub.f32 1.0, %v696_v44 }
 0x783   :  { %v698_v51 = vmul.f32 %v1193_v33, %v697_v49 }
 0x785   :  { %v699_v39 = vadd.f32 %v1193_v33, %v698_v51 }
 0x787   :  { %v703_v54 = vsel %vm702_vm5, %v1193_v33, %v699_v39 }
 0x788   :  { %v708_v55 = vsel %vm705_vm6, %v707_v53, %v703_v54 }
 0x789   :  { %v710_v26 = vmul.f32 %v1189_v36, %v708_v55 }
 0x78b   :  { %713 = vst.msk [vmem:[#allocation14 + $0x30] sm:$0xff] %vm291_vm3, %v710_v26 }
 0x795   :  { %740 = vrot.lane.b32.xlu1 %v1558_v59, %s1421_s12 }
 0x7ef   :  { %v870_v56 = vpop.xlane.xlu1 %869 }
 0x7f0   :  { %1194 = vrcp.f32 %v870_v56  ;;  %v896_v60 = vand.u32 2147483648, %v870_v56  ;;  %v894_v62 = vand.u32 2147483647, %v870_v56  ;;  %vm890_vm8 = vweird.f32 %v870_v56 }
 0x7f1   :  { %1196 = vrcp.f32 %v1423_v29 }
 0x7f2   :  { %v897_v28 = vor.u32 1.1754944e-38, %v896_v60  ;;  %vm895_vm10 = vcmp.eq.f32.partialorder %v894_v62, 8.507059e+37  ;;  %v1043_v60 = vperm.slane %v1516_v14, 2 }
 0x7f6   :  { %v1195_v57 = vpop.eup %1194 }
 0x7f7   :  { %v886_v23 = vmul.f32 %v1195_v57, %v870_v56  ;;  %vm891_vm7 = vweird.f32 %v1195_v57  ;;  %v1197_v30 = vpop.eup %1196 }
 0x7f8   :  { %vm892_vm9 = vmor %vm890_vm8, %vm891_vm7  ;;  %v999_v34 = vmul.f32 32.0, %v1197_v30 }
 0x7f9   :  { %v887_v58 = vsub.f32 1.0, %v886_v23 }
 0x7fa   :  { %v1000_v35 = vsub.f32 1.0, %v999_v34 }
 0x7fb   :  { %v888_v61 = vmul.f32 %v1195_v57, %v887_v58 }
 0x7fc   :  { %v1001_v32 = vmul.f32 %v1197_v30, %v1000_v35 }
 0x7fd   :  { %v889_v18 = vadd.f32 %v1195_v57, %v888_v61 }
 0x7fe   :  { %v1002_v41 = vadd.f32 %v1197_v30, %v1001_v32 }
 0x7ff   :  { %v893_v63 = vsel %vm892_vm9, %v1195_v57, %v889_v18 }
 0x800   :  { %v898_v0 = vsel %vm895_vm10, %v897_v28, %v893_v63  ;;  %v1046_v28 = vperm.slane %v1516_v14, 3 }
 0x801   :  { %v900_v1 = vmul.f32 %v1191_v46, %v898_v0 }
 0x803   :  { %903 = vst.msk [vmem:[#allocation14 + $0x38] sm:$0xff] %vm291_vm3, %v900_v1  ;;  %1132 = vmatmul.msk.f32.vlgmr.msrb.gmra.mxu3 %vm291_vm3, %v900_v1 }
 0x804   :  { %1076 = dma.vmem_to_hbm [thread:$0]  %s1069_s1, 1024, %s1071_s16, [#allocation15], %s1407_s9, %s1407_s9, %s1408_s10  }
 0x807   :  { %v741_v59 = vpop.permute.xlu1 %740 }
 0x808   :  { %761 = vmatpush.msra.mxu1 %v741_v59 }
 0x809   :  { %1124 = vmatmul.msk.f32.vlgmr.msra.gmra.mxu1 %vm291_vm3, %v710_v26 }
 0x80a   :  { %925 = vmatpush.msrb.mxu1 %v1162_v2 }
 0x811   :  { %1131 = vmatmul.msk.f32.vlgmr.msrb.gmra.mxu1 %vm291_vm3, %v1637_v5  ;;  %v987_v5 = vperm.slane %v1516_v14, 1 }
 0x886   :  { %v763_v7 = vpop.f32.mrf.mxu1  ;;  %v953_v9 = vpop.f32.mrf.mxu3 }
 0x887   :  { %1126 = vmatmul.msk.f32.gmra.mxu2 %vm237_vm1, %v763_v7 }
 0x88e   :  { %v927_v8 = vpop.f32.mrf.mxu1 }
 0x88f   :  { %1133 = vmatmul.msk.f32.vlgmr.msrb.gmra.mxu0 %vm237_vm1, %v927_v8 }
 0x897   :  { %1134 = vmatmul.msk.f32.gmra.mxu0 %vm237_vm1, %v953_v9  ;;  %vm1003_vm1 = vweird.f32 %v1197_v30 }
 0x90a   :  { %v792_v17 = vpop.f32.mrf.mxu2 }
 0x90b   :  { %v796_v21 = vadd.f32 %v792_v17, %v605_v19 }
 0x90c   :  { %v979_v13 = vpop.f32.mrf.mxu0 }
 0x90d   :  { %v985_v15 = vadd.f32 %v979_v13, %v795_v12 }
 0x90f   :  { %v988_v16 = vadd.f32 %v987_v5, %v985_v15 }
 0x911   :  { %v990_v20 = vadd.f32 %v988_v16, %v1497_v4  ;;  %v1004_v4 = vsel %vm1003_vm1, %v1197_v30, %v1002_v41 }
 0x913   :  { %v992_v22 = vsel %vm145_vm0, %v990_v20, 0.0 }
 0x914   :  { %993 = vadd.xlane.f32.xlu1 %v992_v22  ;;  %v982_v24 = vpop.f32.mrf.mxu0 }
 0x915   :  { %v986_v25 = vadd.f32 %v982_v24, %v796_v21 }
 0x917   :  { %v989_v27 = vadd.f32 %v987_v5, %v986_v25 }
 0x919   :  { %v991_v31 = vadd.f32 %v989_v27, %v1502_v10 }
 0x91b   :  { %v995_v40 = vsel %vm145_vm0, %v991_v31, 0.0 }
 0x91c   :  { %996 = vadd.xlane.f32.xlu2 %v995_v40 }
 0x987   :  { %v994_v36 = vpop.xlane.xlu1 %993 }
 0x988   :  { %v1005_v37 = vmul.f32 %v1004_v4, %v994_v36 }
 0x98a   :  { %v1007_v38 = vsub.f32 %v990_v20, %v1005_v37 }
 0x98c   :  { %v1009_v42 = vmul.f32 %v1007_v38, %v1007_v38 }
 0x98e   :  { %v1011_v43 = vsel %vm145_vm0, %v1009_v42, 0.0 }
 0x98f   :  { %1012 = vadd.xlane.f32.xlu2 %v1011_v43  ;;  %v997_v10 = vpop.xlane.xlu2 %996 }
 0x990   :  { %v1006_v45 = vmul.f32 %v1004_v4, %v997_v10 }
 0x992   :  { %v1008_v46 = vsub.f32 %v991_v31, %v1006_v45 }
 0x994   :  { %v1010_v47 = vmul.f32 %v1008_v46, %v1008_v46 }
 0x996   :  { %v1014_v33 = vsel %vm145_vm0, %v1010_v47, 0.0 }
 0x997   :  { %1015 = vadd.xlane.f32.xlu0 %v1014_v33 }
 0xa02   :  { %v1013_v44 = vpop.xlane.xlu2 %1012 }
 0xa03   :  { %v1017_v49 = vmul.f32 %v1013_v44, %v1004_v4 }
 0xa05   :  { %v1019_v50 = vadd.f32 1e-05, %v1017_v49 }
 0xa07   :  { %1198 = vrsqrt.f32 %v1019_v50  ;;  %vm1027_vm11 = vweird.f32 %v1019_v50 }
 0xa0a   :  { %v1016_v51 = vpop.xlane.xlu0 %1015 }
 0xa0b   :  { %v1018_v52 = vmul.f32 %v1016_v51, %v1004_v4 }
 0xa0d   :  { %v1199_v39 = vpop.eup %1198  ;;  %v1020_v53 = vadd.f32 1e-05, %v1018_v52 }
 0xa0e   :  { %v1022_v54 = vmul.f32 %v1199_v39, %v1019_v50  ;;  %vm1028_vm3 = vweird.f32 %v1199_v39 }
 0xa0f   :  { %1200 = vrsqrt.f32 %v1020_v53  ;;  %vm1029_vm12 = vmor %vm1027_vm11, %vm1028_vm3  ;;  %vm1037_vm14 = vweird.f32 %v1020_v53 }
 0xa10   :  { %v1023_v55 = vmul.f32 %v1199_v39, %v1022_v54 }
 0xa12   :  { %v1024_v26 = vmul.f32 0.5, %v1023_v55 }
 0xa14   :  { %v1025_v56 = vsub.f32 1.5, %v1024_v26 }
 0xa15   :  { %v1201_v57 = vpop.eup %1200 }
 0xa16   :  { %v1026_v23 = vmul.f32 %v1199_v39, %v1025_v56  ;;  %v1032_v58 = vmul.f32 %v1201_v57, %v1020_v53  ;;  %vm1038_vm13 = vweird.f32 %v1201_v57 }
 0xa17   :  { %vm1039_vm15 = vmor %vm1037_vm14, %vm1038_vm13 }
 0xa18   :  { %v1030_v61 = vsel %vm1029_vm12, %v1199_v39, %v1026_v23  ;;  %v1033_v62 = vmul.f32 %v1201_v57, %v1032_v58 }
 0xa19   :  { %v1041_v18 = vmul.f32 %v1030_v61, %v1007_v38 }
 0xa1a   :  { %v1034_v63 = vmul.f32 0.5, %v1033_v62 }
 0xa1b   :  { %v1044_v0 = vmul.f32 %v1043_v60, %v1041_v18 }
 0xa1c   :  { %v1035_v1 = vsub.f32 1.5, %v1034_v63 }
 0xa1d   :  { %v1047_v59 = vadd.f32 %v1046_v28, %v1044_v0 }
 0xa1e   :  { %v1036_v2 = vmul.f32 %v1201_v57, %v1035_v1 }
 0xa1f   :  { %1049 = vst.msk [vmem:[#allocation13] sm:$0xff] %vm145_vm0, %v1047_v59 }
 0xa20   :  { %v1040_v3 = vsel %vm1039_vm15, %v1201_v57, %v1036_v2 }
 0xa21   :  { %v1042_v6 = vmul.f32 %v1040_v3, %v1008_v46 }
 0xa23   :  { %v1045_v7 = vmul.f32 %v1043_v60, %v1042_v6 }
 0xa25   :  { %v1048_v14 = vadd.f32 %v1046_v28, %v1045_v7 }
 0xa27   :  { %1050 = vst.msk [vmem:[#allocation13 + $0x8] sm:$0xff] %vm145_vm0, %v1048_v14 }
 0xa28   :  { %1063 = dma.vmem_to_hbm [thread:$0]  %s1056_s17, 256, %s1058_s0, [#allocation4], %s1407_s9, %s1407_s9, %s1408_s10  }
 0xa29   :  { %1402 = dma.done.wait [#allocation4], 256  }
 0xa2a   :  { %1403 = vsyncadd [#allocation4], 4294967040 }
 0xa2b   :  { %1404 = dma.done.wait [#allocation15], 1024  }
 0xa2c   :  { %1405 = vsyncadd [#allocation15], 4294966272 }
 0xa2d   :  { %1085 = vsyncpa [#allocation3], 1 }
 0xa2e   :  { %1086 = vsyncpa [#allocation6], 1 }
 0xa2f   :  { %1087 = vsyncpa [#allocation9], 1 }
 0xa30   :  { %1088 = vsyncpa [#allocation12], 1 }
 0xa31   :  { %1089 = vsyncpa [#allocation4], 1 }
 0xa32   :  { %1090 = vsyncpa [#allocation15], 1 }

</bundles_post_ra>
